<compile_context>
chip_gen: v7x
topology: tpu7x:2x2x1
jax: 0.10.0
libtpu: 0.0.40
codegen_flags: <defaults>
</compile_context>

<pallas_src>
import functools
import math

import jax
import jax.numpy as jnp
from jax.experimental import pallas as pl
from jax.experimental.pallas import tpu as pltpu

EPS = 1e-5                      # nn.InstanceNorm2d default eps
TARGET_BLOCK_BYTES = 2 << 20    # ~2 MiB raw x-block: already ~85% of HBM roofline
VMEM_LIMIT_BYTES = 32 << 20     # explicit scoped-VMEM limit, safe on v5e/v6e/v7x


def _round_up(x, m):
    return ((x + m - 1) // m) * m


def _sublane_multiple(itemsize):
    # f32 -> 8, bf16 -> 16, int8/fp8 -> 32 (sub-32-bit dtypes pack along sublanes).
    return max(8, 32 // itemsize)


def _pick_channel_tile(C, HW, itemsize, sub, target_bytes):
    """Largest channel tile that (a) is a multiple of the sublane packing (or the
    full C dim) and (b) keeps one raw x block under target_bytes. If nothing
    fits the budget, returns the smallest legal tile (caller then tiles HW)."""
    if C % sub != 0:
        return C            # full-dim block is always legal
    smallest = None
    tc = C
    while tc >= sub:
        if C % tc == 0 and tc % sub == 0:
            if tc * HW * itemsize <= target_bytes:
                return tc
            smallest = tc
        tc -= sub
    return smallest if smallest is not None else C


# ---------------------------------------------------------------------------
# Fused single-pass kernel: whole HW of a channel tile resides in VMEM.
# ---------------------------------------------------------------------------
def _adain_fused_kernel(x_ref, mod_ref, o_ref, *, hw_true):
    # x_ref  : (1, tc, HWp)  channel-major block of one sample (HWp lane-dense)
    # mod_ref: (1, tc, 2)    [..., 0] = 1 + gamma, [..., 1] = beta
    x = x_ref[0].astype(jnp.float32)                        # (tc, HWp), f32 stats
    hw_pad = x.shape[-1]
    inv_n = 1.0 / hw_true
    mean = jnp.sum(x, axis=-1, keepdims=True) * inv_n       # zero padding is inert
    xm = x - mean                                           # reused for var & out
    sq = xm * xm
    if hw_pad != hw_true:                                   # static branch
        lane = jax.lax.broadcasted_iota(jnp.int32, sq.shape, 1)
        sq = jnp.where(lane < hw_true, sq, 0.0)             # mask pad lanes
    var = jnp.sum(sq, axis=-1, keepdims=True) * inv_n       # biased (InstanceNorm2d)
    scale = jax.lax.rsqrt(var + EPS) * mod_ref[0, :, 0:1]   # (tc, 1)
    o_ref[0] = (xm * scale + mod_ref[0, :, 1:2]).astype(o_ref.dtype)


# ---------------------------------------------------------------------------
# Large-HW two-pass path: stats accumulation sweep + apply sweep.
# ---------------------------------------------------------------------------
def _adain_stats_kernel(x_ref, s1_ref, s2_ref):
    @pl.when(pl.program_id(2) == 0)
    def _():
        s1_ref[...] = jnp.zeros_like(s1_ref)
        s2_ref[...] = jnp.zeros_like(s2_ref)
    x = x_ref[0].astype(jnp.float32)                        # (tc, t_hw)
    s1_ref[0] += jnp.sum(x, axis=-1, keepdims=True)         # pad zeros contribute 0
    s2_ref[0] += jnp.sum(x * x, axis=-1, keepdims=True)


def _adain_apply_kernel(x_ref, ss_ref, o_ref):
    # ss_ref: (1, tc, 2) with [..., 0] = scale, [..., 1] = shift
    x = x_ref[0].astype(jnp.float32)
    o_ref[0] = (x * ss_ref[0, :, 0:1] + ss_ref[0, :, 1:2]).astype(o_ref.dtype)


def adain_forward(x_nchw, w, lin_weight, lin_bias, *,
                  target_bytes=TARGET_BLOCK_BYTES):
    """x_nchw: (N, C, H, W); w: (N, w_dim);
    lin_weight: (2C, w_dim), lin_bias: (2C,)  (PyTorch nn.Linear convention)."""
    N, C, H, W = x_nchw.shape
    HW = H * W
    itemsize = jnp.dtype(x_nchw.dtype).itemsize
    sub = _sublane_multiple(itemsize)

    # Hoisted style Linear: one tiny XLA matmul for all N samples.
    h = (w @ lin_weight.T + lin_bias).astype(jnp.float32)   # (N, 2C)
    g1 = 1.0 + h[:, :C]                                     # (N, C) = 1 + gamma
    beta = h[:, C:]                                         # (N, C)

    def _cparams(sem):
        return pltpu.CompilerParams(dimension_semantics=sem,
                                    vmem_limit_bytes=VMEM_LIMIT_BYTES)

    hw128 = _round_up(HW, 128)                              # lane-dense stores
    tc = _pick_channel_tile(C, hw128, itemsize, sub, target_bytes)
    fused = tc * hw128 * itemsize <= target_bytes

    if fused:
        # Ensure >= 2 grid steps (v7x has 2 TCs; also gives the pipeline overlap).
        while N * (C // tc) < 2 and tc % (2 * sub) == 0:
            tc //= 2
        n_ct = C // tc
        hw_pad = hw128
        x_cm = x_nchw.reshape(N, C, HW)
        if hw_pad != HW:
            x_cm = jnp.pad(x_cm, ((0, 0), (0, 0), (0, hw_pad - HW)))
        mod = jnp.stack([g1, beta], axis=-1)                # (N, C, 2), one side DMA
        out_cm = pl.pallas_call(
            functools.partial(_adain_fused_kernel, hw_true=HW),
            out_shape=jax.ShapeDtypeStruct((N, C, hw_pad), x_nchw.dtype),
            grid=(N, n_ct),
            in_specs=[
                pl.BlockSpec((1, tc, hw_pad), lambda n, c: (n, c, 0)),
                pl.BlockSpec((1, tc, 2), lambda n, c: (n, c, 0)),
            ],
            out_specs=pl.BlockSpec((1, tc, hw_pad), lambda n, c: (n, c, 0)),
            compiler_params=_cparams(("parallel", "parallel")),
        )(x_cm, mod)
    else:
        # HW tiling path: even the smallest channel tile exceeds the block budget.
        t_hw = max(128, ((target_bytes // (tc * itemsize)) // 128) * 128)
        hw_pad = _round_up(HW, t_hw)
        n_hw = hw_pad // t_hw
        n_ct = C // tc
        x_cm = x_nchw.reshape(N, C, HW)
        if hw_pad != HW:
            x_cm = jnp.pad(x_cm, ((0, 0), (0, 0), (0, hw_pad - HW)))

        s1, s2 = pl.pallas_call(
            _adain_stats_kernel,
            out_shape=(jax.ShapeDtypeStruct((N, C, 1), jnp.float32),
                       jax.ShapeDtypeStruct((N, C, 1), jnp.float32)),
            grid=(N, n_ct, n_hw),
            in_specs=[pl.BlockSpec((1, tc, t_hw), lambda n, c, k: (n, c, k))],
            out_specs=(pl.BlockSpec((1, tc, 1), lambda n, c, k: (n, c, 0)),
                       pl.BlockSpec((1, tc, 1), lambda n, c, k: (n, c, 0))),
            compiler_params=_cparams(("parallel", "parallel", "arbitrary")),
        )(x_cm)

        # Finalize per-channel scale/shift on (N, C) — tiny XLA math.
        # TODO(synk): E[x^2]-E[x]^2 in f32 can cancel for very-large-mean
        # activations; switch to a Welford-style accumulation if that arises.
        mean = s1[..., 0] / HW
        var = jnp.maximum(s2[..., 0] / HW - mean * mean, 0.0)
        scale = jax.lax.rsqrt(var + EPS) * g1
        shift = beta - mean * scale
        ss = jnp.stack([scale, shift], axis=-1)             # (N, C, 2)

        out_cm = pl.pallas_call(
            _adain_apply_kernel,
            out_shape=jax.ShapeDtypeStruct((N, C, hw_pad), x_nchw.dtype),
            grid=(N, n_ct, n_hw),
            in_specs=[
                pl.BlockSpec((1, tc, t_hw), lambda n, c, k: (n, c, k)),
                pl.BlockSpec((1, tc, 2), lambda n, c, k: (n, c, 0)),
            ],
            out_specs=pl.BlockSpec((1, tc, t_hw), lambda n, c, k: (n, c, k)),
            compiler_params=_cparams(("parallel", "parallel", "parallel")),
        )(x_cm, ss)

    if hw_pad != HW:
        out_cm = out_cm[:, :, :HW]
    return out_cm.reshape(N, C, H, W)


def adain_ref(x, w, lin_weight, lin_bias):
    """Plain-JAX reference mirroring the PyTorch forward."""
    mean = x.mean(axis=(2, 3), keepdims=True)
    var = ((x - mean) ** 2).mean(axis=(2, 3), keepdims=True)   # biased
    xn = (x - mean) / jnp.sqrt(var + EPS)
    h = w @ lin_weight.T + lin_bias
    C = x.shape[1]
    gamma = h[:, :C][:, :, None, None]
    beta = h[:, C:][:, :, None, None]
    return xn * (1.0 + gamma) + beta


if __name__ == "__main__":
    key = jax.random.PRNGKey(0)

    def run_case(N, C, H, W, w_dim, **kw):
        k = jax.random.fold_in(key, N * 1000 + C * 100 + H)
        kx, kw_, kwt, kb = jax.random.split(k, 4)
        x = jax.random.normal(kx, (N, C, H, W), dtype=jnp.float32)
        wv = jax.random.normal(kw_, (N, w_dim), dtype=jnp.float32)
        bound = 1.0 / math.sqrt(w_dim)        # nn.Linear default init range
        lin_w = jax.random.uniform(kwt, (2 * C, w_dim), jnp.float32,
                                   minval=-bound, maxval=bound)
        lin_b = jax.random.uniform(kb, (2 * C,), jnp.float32,
                                   minval=-bound, maxval=bound)
        out = jax.block_until_ready(adain_forward(x, wv, lin_w, lin_b, **kw))
        ref = adain_ref(x, wv, lin_w, lin_b)
        assert out.shape == x.shape and out.dtype == x.dtype
        err = float(jnp.max(jnp.abs(out - ref)))
        assert jnp.allclose(out, ref, atol=2e-4, rtol=2e-4), err
        return out

    # Main case (fused path, HW a multiple of 128): x (2, 4, 16, 16), w (2, 32).
    run_case(2, 4, 16, 16, 32)
    # Non-128-multiple HW (7x7=49): padded to lane-dense, masked stats.
    run_case(2, 4, 7, 7, 32)
    # Force the large-HW two-pass tiled path at a small shape (tiny block budget).
    run_case(1, 8, 32, 32, 32, target_bytes=4096)

    print("KERNEL_OK")
</pallas_src>

<mosaic_0001>
module attributes {stable_mosaic.version = 11 : i64} {
  func.func @_adain_fused_kernel(%arg0: i32, %arg1: i32, %arg2: memref<1x4x256xf32, #tpu.memory_space<vmem>>, %arg3: memref<1x4x2xf32, #tpu.memory_space<vmem>>, %arg4: memref<1x4x256xf32, #tpu.memory_space<vmem>>) attributes {dimension_semantics = [#tpu.dimension_semantics<parallel>, #tpu.dimension_semantics<parallel>], iteration_bounds = array<i64: 2, 1>, scalar_prefetch = 0 : i64, scratch_operands = 0 : i64, tpu.core_type = #tpu.core_type<tc>, window_params = [{transform_indices = @transform_0, window_bounds = array<i64: 1, 4, 256>}, {transform_indices = @transform_1, window_bounds = array<i64: 1, 4, 2>}, {transform_indices = @transform_2, window_bounds = array<i64: 1, 4, 256>}]} {
    %c0 = arith.constant 0 : index
    %c0_0 = arith.constant 0 : index
    %c0_1 = arith.constant 0 : index
    %0 = vector.load %arg2[%c0, %c0_0, %c0_1] : memref<1x4x256xf32, #tpu.memory_space<vmem>>, vector<1x4x256xf32>
    %1 = vector.shape_cast %0 : vector<1x4x256xf32> to vector<4x256xf32>
    %cst = arith.constant dense<0.000000e+00> : vector<4xf32>
    %2 = vector.multi_reduction <add>, %1, %cst [1] : vector<4x256xf32> to vector<4xf32>
    %3 = vector.shape_cast %2 : vector<4xf32> to vector<4x1xf32>
    %cst_2 = arith.constant 3.906250e-03 : f32
    %4 = vector.broadcast %cst_2 : f32 to vector<4x1xf32>
    %5 = arith.mulf %3, %4 : vector<4x1xf32>
    %6 = vector.broadcast %5 : vector<4x1xf32> to vector<4x256xf32>
    %7 = arith.subf %1, %6 : vector<4x256xf32>
    %8 = arith.mulf %7, %7 : vector<4x256xf32>
    %cst_3 = arith.constant dense<0.000000e+00> : vector<4xf32>
    %9 = vector.multi_reduction <add>, %8, %cst_3 [1] : vector<4x256xf32> to vector<4xf32>
    %10 = vector.shape_cast %9 : vector<4xf32> to vector<4x1xf32>
    %cst_4 = arith.constant 3.906250e-03 : f32
    %11 = vector.broadcast %cst_4 : f32 to vector<4x1xf32>
    %12 = arith.mulf %10, %11 : vector<4x1xf32>
    %cst_5 = arith.constant 9.99999974E-6 : f32
    %13 = vector.broadcast %cst_5 : f32 to vector<4x1xf32>
    %14 = arith.addf %12, %13 : vector<4x1xf32>
    %15 = math.rsqrt %14 : vector<4x1xf32>
    %c0_6 = arith.constant 0 : index
    %c0_7 = arith.constant 0 : index
    %c0_8 = arith.constant 0 : index
    %16 = vector.load %arg3[%c0_6, %c0_7, %c0_8] : memref<1x4x2xf32, #tpu.memory_space<vmem>>, vector<1x4x1xf32>
    %17 = vector.shape_cast %16 : vector<1x4x1xf32> to vector<4x1xf32>
    %18 = arith.mulf %15, %17 : vector<4x1xf32>
    %19 = vector.broadcast %18 : vector<4x1xf32> to vector<4x256xf32>
    %20 = arith.mulf %7, %19 : vector<4x256xf32>
    %c0_9 = arith.constant 0 : index
    %c0_10 = arith.constant 0 : index
    %c1 = arith.constant 1 : index
    %21 = vector.load %arg3[%c0_9, %c0_10, %c1] : memref<1x4x2xf32, #tpu.memory_space<vmem>>, vector<1x4x1xf32>
    %22 = vector.shape_cast %21 : vector<1x4x1xf32> to vector<4x1xf32>
    %23 = vector.broadcast %22 : vector<4x1xf32> to vector<4x256xf32>
    %24 = arith.addf %20, %23 : vector<4x256xf32>
    %c0_11 = arith.constant 0 : index
    %c0_12 = arith.constant 0 : index
    %c0_13 = arith.constant 0 : index
    %25 = vector.load %arg4[%c0_11, %c0_12, %c0_13] : memref<1x4x256xf32, #tpu.memory_space<vmem>>, vector<1x4x256xf32>
    %26 = vector.shape_cast %25 : vector<1x4x256xf32> to vector<4x256xf32>
    %27 = vector.shape_cast %24 : vector<4x256xf32> to vector<1x4x256xf32>
    tpu.vector_store %arg4[%c0_11, %c0_12, %c0_13], %27 {strides = array<i32>} : memref<1x4x256xf32, #tpu.memory_space<vmem>>, vector<1x4x256xf32>,
    return
  }
  func.func @transform_0(%arg0: i32, %arg1: i32) -> (i32, i32, i32) {
    %c0_i32 = arith.constant 0 : i32
    %c0_i32_0 = arith.constant 0 : i32
    return %arg0, %arg1, %c0_i32 : i32, i32, i32
  }
  func.func @transform_1(%arg0: i32, %arg1: i32) -> (i32, i32, i32) {
    %c0_i32 = arith.constant 0 : i32
    %c0_i32_0 = arith.constant 0 : i32
    return %arg0, %arg1, %c0_i32 : i32, i32, i32
  }
  func.func @transform_2(%arg0: i32, %arg1: i32) -> (i32, i32, i32) {
    %c0_i32 = arith.constant 0 : i32
    %c0_i32_0 = arith.constant 0 : i32
    return %arg0, %arg1, %c0_i32 : i32, i32, i32
  }
}

</mosaic_0001>

<bundles_post_ra>
// kernel: tpu_custom_call.1
= control target key start
LH: loop header
LB: loop body
LE: loop exit
PB: predicated region body
PF: predicated region fallthrough
CT: control target
= control target key end

     0   :  { %7 = vsyncpa [#allocation3], 0  ;;  %s792_s0 = inlined_call_operand.hbm [shape: f32[2,4,256], index: 0, kind: input, shape index: {}]   ;;  %s793_s1 = inlined_call_operand.vmem [shape: f32[2,4,2], index: 1, kind: input, shape index: {}]   ;;  %s794_s2 = inlined_call_operand.hbm [shape: f32[2,4,256], index: 2, kind: output, shape index: {}]  }
   0x1   :  { %9 = vsyncpa [#allocation3 + $0x1], 0 }
   0x2   :  { %10 = vsyncpa [#allocation4], 0 }
   0x3   :  { %12 = vsyncpa [#allocation4 + $0x1], 0  ;;  %s607_s9 = smov 0   ;;  %s609_s10 = smov 0  }
   0x4   :  { %s611_s11 = smov 0   ;;  %s613_s12 = smov 0  }
   0x5   :  { %s615_s13 = smov 0   ;;  %s617_s14 = smov 0  }
   0x6 LB: > { %s384_s15 = sadd.s32 4294967295, %s585_s14   ;;  %s385_s16 = sadd.s32 4294967294, %s585_s14   ;;  %s585_s14 = sphi %s617_s14, %s18_s14   ;;  %s581_s13 = sphi %s615_s13, %s810_s13   ;;  %s577_s12 = sphi %s613_s12, %s809_s12   ;;  %s573_s11 = sphi %s611_s11, %s808_s11   ;;  %s569_s10 = sphi %s609_s10, %s807_s10   ;;  %s565_s9 = sphi %s607_s9, %s806_s9  }
   0x7   : > { %s30_s17 = sadd.s32 1, %s581_s13  ;;  %s39_s18 = sadd.s32 1, %s573_s11 }
   0x8   : > { %p32_p0 = scmp.ge.s32.totalorder %s30_s17, 2  ;;  %p46_p1 = scmp.ne.s32.totalorder %s573_s11, %s569_s10 }
   0x9   : > { %p47_p2 = scmp.eq.s32.totalorder %s585_s14, 0  ;;  %p52_p3 = scmp.ne.s32.totalorder %s569_s10, %s565_s9 }
   0xa   : > { %s812_s17 = smov (%p32_p0, %s30_s17), 0  ;;  %p53_p5 = scmp.eq.s32.totalorder %s384_s15, 0 }
   0xb   : > { %p648_p4 = por %p47_p2, %p46_p1  ;;  %s34_s20 = ssub.s32 %s581_s13, %s812_s17 }
   0xc   : > { %p106_p6 = scmp.eq.s32.totalorder %s384_s15, 1  ;;  %p37_p7 = scmp.eq.s32.totalorder %s34_s20, 0 }
   0xd   : > { %p654_p8 = por %p53_p5, %p52_p3  ;;  %p112_p10 = scmp.eq.s32.totalorder %s385_s16, 1 }
   0xe   : > { %p658_p9 = por %p106_p6, %p46_p1  ;;  %p414_p13 = scmp.lt.s32.totalorder %s585_s14, 2 }
   0xf   : > { %s663_s23 = scalar_select %p37_p7, %s573_s11, %s39_s18  }
  0x10   : > { %s798_s22 = scalar_select %p658_p9, 1, 0 }
  0x11   : > { %p665_p11 = por %p112_p10, %p52_p3  ;;  %s132_s25 = sand.u32 1, %s573_s11  }
  0x12   : > { %s388_s26 = sshll.u32 %s132_s25, 3  ;;  %s400_s27 = sshll.u32 %s581_s13, 7 }
  0x13   : > { %s799_s24 = scalar_select %p665_p11, 1, 0 }
  0x14   : > { %s676_s30 = scalar_lea.hbm %s792_s0, %s400_s27  ;;  %s136_s3 = scalar_lea.vmem [#allocation2], %s388_s26 }
  0x15   : > { %s146_s4 = sshll.u32 %s136_s3, 4  ;;  %p682_p0 = pnand %p414_p13, %p648_p4  ;;  %s678_s4 = int_to_ptr.vmem [resolvable:$true] %s146_s4 }
  0x16   : > { %s133_s6 = scalar_lea.sflag [#allocation3], %s132_s25  ;;  %s473_s7 = scalar_lea.hbm %s676_s30, 128 }
  0x17   : > { %p474_p3 = scmp.ne.s32.totalorder %s676_s30, %s473_s7  ;;  %p475_p5 = pneg %p682_p0 }
  0x18   : > { %s478_s16 = scalar_lea.hbm %s792_s0, 256  ;;  %p479_p4 = scmp.lt.u32.totalorder %s676_s30, %s792_s0 }
  0x19   : > { %p476_p6 = pnand %p475_p5, %p474_p3  ;;  %p480_p10 = scmp.lt.u32.totalorder %s478_s16, %s473_s7 }
  0x1a   : > { %p482_p12 = scmp.lt.u32.totalorder %s473_s7, %s676_s30 }
  0x1b   : > { %p477_p7 = pneg %p476_p6  ;;  %p481_p13 = por %p480_p10, %p479_p4 }
  0x1d   : > { %p483_p1 = por %p482_p12, %p481_p13 }
  0x1f   : > { %p484_p2 = pnand %p483_p1, %p477_p7 }
  0x21   : > { %487 = shalt.err (!%p484_p2)
}
  0x22   : > { %s488_s20 = scalar_lea.vmem %s678_s4, 128  ;;  %s587_s25 = smov [#allocation2]  }
  0x23   : > { %p489_p3 = scmp.ne.s32.totalorder %s678_s4, %s488_s20  ;;  %s493_s26 = sshll.u32 %s587_s25, 4  ;;  %s494_s26 = int_to_ptr.vmem [resolvable:$false] %s493_s26 }
  0x24   : > { %s495_s27 = scalar_lea.vmem %s494_s26, 256  ;;  %p496_p9 = scmp.lt.s32.totalorder %s678_s4, %s494_s26 }
  0x25   : > { %p491_p6 = pnand %p489_p3, %p475_p5  ;;  %p497_p4 = scmp.lt.s32.totalorder %s495_s27, %s488_s20 }
  0x27   : > { %p492_p11 = pneg %p491_p6  ;;  %p498_p10 = por %p497_p4, %p496_p9 }
  0x29   : > { %p499_p12 = pnand %p498_p10, %p492_p11 }
  0x2b   : > { %502 = shalt.err (!%p499_p12)
}
  0x2c   : > { %409 = dma.hbm_to_vmem [thread:$0]  (!%p682_p0), %s676_s30, 128, %s678_s4, %s133_s6  }
  0x2d   : > { %p801_p1 = scmp.lt.s32.totalorder %s585_s14, 3  ;;  %p802_p2 = scmp.ge.s32.totalorder %s585_s14, 1 }
  0x2f   : > { %p162_p5 = pnand %p802_p2, %p801_p1 }
  0x30   : > { %s718_s28 = sand.u32 (!%p162_p5), 1, %s569_s10  }
  0x31   : > { %165 = sbr.rel (%p162_p5) target bundleno = 528 (0x210), region = 28  ;;  %s392_s29 = sshll.u32 (!%p162_p5), %s718_s28, 3 }
  0x32   : > { %s168_s3 = scalar_lea.sflag (!%p162_p5), [#allocation3], %s718_s28  ;;  %s171_s5 = scalar_lea.vmem (!%p162_p5), [#allocation2], %s392_s29 }
  0x38   : > { %556 = dma.done.wait (%p654_p8), %s168_s3, 128  }
  0x39   : > { %558 = vsyncadd (%p654_p8), %s168_s3, 4294967168  ;;  %vm210_vm0 = vcmask 1043456   ;;  %v206_v0 = vld [vmem:[%s171_s5] sm:$0xff]  ;;  %v588_v5 = vmov 839922192   ;;  %v221_v7 = vlaneseq  ;;  %v589_v20 = vmov 0  }
  0x3a   : > { %v208_v1 = vcombine.high %v206_v0, %v206_v0  ;;  %v211_v2 = vsel %vm210_vm0, %v206_v0, 0.0  ;;  %v219_v6 = vunpack.c.l.s4 %v588_v5  ;;  %467 = vset.pattern.permute.xlu1 %v589_v20  ;;  %v590_v21 = vmov 1   ;;  %p199_p8 = scmp.lt.s32.totalorder %s577_s12, 1  ;;  %s401_s8 = sshll.u32 %s577_s12, 7 }
  0x3b   : > { %v222_v9 = vshrl.u32 %v221_v7, 7  ;;  %469 = vset.pattern.permute.xlu0 %v590_v21  ;;  %s198_s15 = scalar_lea.vmem [#allocation5], %s392_s29  ;;  %s743_s20 = scalar_lea.hbm %s794_s2, %s401_s8 }
  0x3c   : > { %v212_v3 = vsel %vm210_vm0, %v208_v1, 0.0  ;;  %v220_v8 = vunpack.c.0.s8 %v219_v6  ;;  %s200_s21 = scalar_select %p199_p8, %s577_s12, 1 }
  0x3d   : > { %v213_v4 = vadd.f32 %v212_v3, %v211_v2  ;;  %s285_s16 = sshll.u32 %s198_s15, 4  ;;  %s269_s25 = scalar_lea.sflag [#allocation4], %s718_s28  ;;  %s745_s16 = int_to_ptr.vmem [resolvable:$true] %s285_s16 }
  0x3e   : > { %v223_v10 = vsub.s32 %v220_v8, %v222_v9  ;;  %s394_s30 = sshll.u32 %s200_s21, 2  ;;  %s503_s26 = scalar_lea.vmem %s745_s16, 128 }
  0x3f   : > { %214 = vadd.xlane.f32.xlu0 %v213_v4  ;;  %s205_s7 = scalar_lea.vmem %s793_s1, %s394_s30  ;;  %p504_p9 = scmp.ne.s32.totalorder %s745_s16, %s503_s26 }
  0x40   : > { %v239_v25 = vld [vmem:[%s205_s7] sm:$0xf]  ;;  %p803_p11 = scmp.ne.s32.totalorder %s798_s22, 0  ;;  %s591_s12 = smov [#allocation5]  }
  0x41   : > { %s507_s27 = sshll.u32 %s591_s12, 4  ;;  %s508_s27 = int_to_ptr.vmem [resolvable:$false] %s507_s27 }
  0x42   : > { %p505_p0 = pnand %p504_p9, %p803_p11  ;;  %s509_s29 = scalar_lea.vmem %s508_s27, 256 }
  0x43   : > { %p510_p13 = scmp.lt.s32.totalorder %s745_s16, %s508_s27  ;;  %p511_p3 = scmp.lt.s32.totalorder %s509_s29, %s503_s26 }
  0x44   : > { %p506_p7 = pneg %p505_p0 }
  0x45   : > { %p512_p6 = por %p511_p3, %p510_p13 }
  0x47   : > { %p513_p4 = pnand %p512_p6, %p506_p7 }
  0xcc   : > { %v215_v11 = vpop.xlane.xlu0 %214 }
  0xcd   : > { %v216_v12 = vmul.f32 0.00390625, %v215_v11 }
  0xcf   : > { %v224_v13 = vrot.slane %v216_v12, %v223_v10 }
  0xd1   : > { %v226_v14 = vsub.f32 %v206_v0, %v224_v13 }
  0xd3   : > { %v227_v15 = vmul.f32 %v226_v14, %v226_v14 }
  0xd5   : > { %v229_v16 = vcombine.high %v227_v15, %v227_v15  ;;  %v231_v17 = vsel %vm210_vm0, %v227_v15, 0.0 }
  0xd7   : > { %v232_v18 = vsel %vm210_vm0, %v229_v16, 0.0 }
  0xd8   : > { %v233_v19 = vadd.f32 %v232_v18, %v231_v17 }
  0xda   : > { %234 = vadd.xlane.f32.xlu0 %v233_v19 }
 0x167   : > { %v235_v22 = vpop.xlane.xlu0 %234 }
 0x168   : > { %v236_v23 = vmul.f32 0.00390625, %v235_v22 }
 0x16a   : > { %v237_v24 = vadd.f32 1e-05, %v236_v23 }
 0x16c   : > { %471 = vrsqrt.f32 %v237_v24 }
 0x176   : > { %v472_v26 = vpop.eup %471 }
 0x177   : > { %v240_v27 = vmul.f32 %v472_v26, %v239_v25 }
 0x179   : > { %243 = vperm.xlu1 %467, %v240_v27  }
 0x17d   : > { %468 = vset.pattern.permute.xlu1 %v590_v21 }
 0x17e   : > { %256 = vperm.xlu1 %468, %v239_v25  }
 0x1f8   : > { %v244_v28 = vpop.permute.xlu1 %243 }
 0x1f9   : > { %v251_v29 = vrot.slane %v244_v28, %v223_v10 }
 0x1fb   : > { %v253_v31 = vmul.f32 %v251_v29, %v226_v14 }
 0x1fd   : > { %v257_v30 = vpop.permute.xlu1 %256 }
 0x1fe   : > { %v264_v32 = vrot.slane %v257_v30, %v223_v10 }
 0x200   : > { %v266_v33 = vadd.f32 %v264_v32, %v253_v31 }
 0x202   : > { %267 = vst [vmem:[%s198_s15] sm:$0xff] %v266_v33 }
 0x203   : > { %516 = shalt.err (!%p513_p4)
}
 0x204   : > { %s517_s28 = scalar_lea.hbm %s743_s20, 128  ;;  %s521_s21 = scalar_lea.hbm %s794_s2, 256 }
 0x205   : > { %p518_p10 = scmp.ne.s32.totalorder %s743_s20, %s517_s28  ;;  %p522_p2 = scmp.lt.u32.totalorder %s743_s20, %s794_s2 }
 0x206   : > { %p523_p5 = scmp.lt.u32.totalorder %s521_s21, %s517_s28  ;;  %p525_p9 = scmp.lt.u32.totalorder %s517_s28, %s743_s20 }
 0x207   : > { %p519_p12 = pnand %p518_p10, %p803_p11 }
 0x208   : > { %p524_p8 = por %p523_p5, %p522_p2 }
 0x209   : > { %p520_p1 = pneg %p519_p12 }
 0x20a   : > { %p526_p0 = por %p525_p9, %p524_p8 }
 0x20c   : > { %p527_p7 = pnand %p526_p0, %p520_p1 }
 0x20e   : > { %530 = shalt.err (!%p527_p7)
}
 0x20f   : > { %404 = dma.vmem_to_hbm [thread:$0]  (%p803_p11), %s745_s16, 128, %s743_s20, %s269_s25  }
 0x210 PF: > { %s297_s6 = sand.u32 1, %s565_s9   ;;  %p804_p13 = scmp.ne.s32.totalorder %s799_s24, 0 }
 0x211   : > { %p805_p3 = scmp.ge.s32.totalorder %s585_s14, 2  ;;  %s298_s7 = scalar_lea.sflag [#allocation4], %s297_s6 }
 0x213   : > { %p411_p6 = pnand %p805_p3, %p804_p13 }
 0x215   : > { %560 = dma.done.wait (!%p411_p6), %s298_s7, 128  }
 0x216   : > { %562 = vsyncadd (!%p411_p6), %s298_s7, 4294967168  ;;  %s18_s14 = sadd.s32 1, %s585_s14   ;;  %s806_s9 = smov %s569_s10 }
 0x217   : > { %p15_p4 = scmp.ge.s32.totalorder %s18_s14, 4   ;;  %s807_s10 = smov %s573_s11 }
 0x218   : > { %s808_s11 = smov %s663_s23  ;;  %s809_s12 = smov %s581_s13 }
 0x219   : > { %s810_s13 = smov %s812_s17  ;;  %17 = sbr.rel (!%p15_p4) target bundleno = 6 (0x6), region = 76 }
 0x220   :  { %303 = vsyncpa [#allocation3], 1 }
 0x221   :  { %305 = vsyncpa [#allocation3 + $0x1], 1 }
 0x222   :  { %306 = vsyncpa [#allocation4], 1 }
 0x223   :  { %308 = vsyncpa [#allocation4 + $0x1], 1 }

</bundles_post_ra>
